<compile_context>
chip_gen: v5e
topology: v5e:2x2
jax: 0.10.0
libtpu: 0.0.40
codegen_flags: <defaults>
</compile_context>

<pallas_src>
import math
import numpy as np

import jax
import jax.numpy as jnp
from jax.experimental import pallas as pl
from jax.experimental.pallas import tpu as pltpu

_HI = jax.lax.Precision.HIGHEST


def _mccp_kernel(win_ref, mbd_ref, rep_ref, g1_ref, out_ref, acc_ref):
    step = pl.program_id(1)

    @pl.when(step == 0)
    def _init():
        acc_ref[...] = jnp.zeros_like(acc_ref)

    # (ROWS, K) lane-dense rows; single upcast, all epilogue math in f32.
    rows = win_ref[...].astype(jnp.float32)

    # p[row, (w,c,r')]  = sum_r x_w[r] * M_c[r, r']   (MXU, K = PK*R = 128)
    # xt[row, (w,c,r')] = x_w[r']                     (MXU, 0/1 replication)
    p = jnp.dot(rows, mbd_ref[...], preferred_element_type=jnp.float32)
    xt = jnp.dot(rows, rep_ref[...], preferred_element_type=jnp.float32)

    # Lane-dense quadratic form: one VPU multiply, then the per-(window,
    # capsule) R-sum on the MXU via the 0/1 group-sum matrix G1.
    s = jnp.dot(p * xt, g1_ref[...], preferred_element_type=jnp.float32)

    # PSD in exact arithmetic; clamp to avoid NaN from rounding.
    s = jnp.sqrt(jnp.maximum(s, 0.0))

    # Reduce over the window groups in this chunk (zero-padded rows give 0)
    # into the resident per-batch f32 accumulator.
    acc_ref[...] += jnp.sum(s, axis=0, keepdims=True)           # (1, PK*C)

    @pl.when(step == pl.num_programs(1) - 1)
    def _finalize():
        out_ref[...] = acc_ref[...]                             # written once


def mccp_forward(x, weight, *, reciptive, strides, eps=1e-4,
                 compute_dtype=jnp.float32,
                 vmem_budget_bytes=10 * (1 << 20)):
    """Pallas implementation of MCCP.forward.  x: (B, in_features)."""
    B, N = x.shape
    C, D, R = weight.shape
    assert R == reciptive
    S = strides

    # --- hoisted algebra (plain JAX, f32) -----------------------------------
    # TODO(synk): matrix inverse has no clean Pallas TPU equivalent; kept in JAX.
    w32 = weight.astype(jnp.float32)
    wwT = jnp.einsum('cdr,cer->cde', w32, w32, precision=_HI)
    sigma = jnp.linalg.inv(wwT + eps * jnp.eye(D, dtype=jnp.float32))
    M = jnp.einsum('cdr,cde,ces->crs', w32, sigma, w32, precision=_HI)  # (C,R,R)

    # --- K packing: PK windows share one 128-lane contraction ---------------
    PK = 128 // R if (R <= 128 and 128 % R == 0) else 1
    K = PK * R                        # matmul contraction depth (128 when packed)
    CR = C * R
    NCOL = PK * CR
    NCOL_pad = ((NCOL + 127) // 128) * 128
    PKC = PK * C

    # Fused constants (all f32, resident in VMEM; review item 11).
    blk = jnp.transpose(M, (1, 0, 2)).reshape(R, CR)            # [M_0 | ... | M_{C-1}]
    eye_pk = jnp.eye(PK, dtype=jnp.float32)
    M_bd = jnp.kron(eye_pk, blk)                                # (K, NCOL) block-diag
    REP = jnp.kron(eye_pk, jnp.tile(jnp.eye(R, dtype=jnp.float32), (1, C)))
    G1 = jnp.kron(jnp.eye(PKC, dtype=jnp.float32),
                  jnp.ones((R, 1), jnp.float32))                # (NCOL, PK*C)
    if NCOL_pad != NCOL:
        M_bd = jnp.pad(M_bd, ((0, 0), (0, NCOL_pad - NCOL)))
        REP = jnp.pad(REP, ((0, 0), (0, NCOL_pad - NCOL)))
        G1 = jnp.pad(G1, ((0, NCOL_pad - NCOL), (0, 0)))

    # --- wrap-around windows, packed lane-dense -----------------------------
    # NOTE(review item 5): this wrapper-side gather still duplicates x by
    # ~R/strides in HBM; in-kernel construction from resident x was skipped.
    starts = np.arange(0, N, S)
    W = int(starts.shape[0])
    idx = (starts[:, None] + np.arange(R)[None, :]) % N         # (W, R)
    n_groups = -(-W // PK)                                      # window groups / batch

    # --- rows-per-step from an explicit VMEM budget (items 2 & 8) -----------
    itemsize = jnp.dtype(compute_dtype).itemsize
    bytes_per_row = (2 * K * itemsize        # double-buffered window block
                     + 4 * K                 # f32 upcast of the rows
                     + 3 * 4 * NCOL_pad      # p, xt, p*xt intermediates
                     + 2 * 4 * PKC)          # s / sqrt(s)
    rows_budget = max(8, (int(vmem_budget_bytes) // bytes_per_row) // 8 * 8)
    ROWS = min(-(-n_groups // 8) * 8, rows_budget)
    n_chunks = -(-n_groups // ROWS)
    g_pad = n_chunks * ROWS

    win = x[:, idx].astype(compute_dtype)                       # (B, W, R), one cast
    pad_w = g_pad * PK - W
    if pad_w:
        win = jnp.pad(win, ((0, 0), (0, pad_w), (0, 0)))
    packed = win.reshape(B, g_pad, K)                           # lane-dense rows

    out3 = pl.pallas_call(
        _mccp_kernel,
        out_shape=jax.ShapeDtypeStruct((B, 1, PKC), jnp.float32),
        grid_spec=pltpu.PrefetchScalarGridSpec(
            num_scalar_prefetch=0,
            grid=(B, n_chunks),
            in_specs=[
                pl.BlockSpec((None, ROWS, K), lambda b, i: (b, i, 0)),  # windows
                pl.BlockSpec((K, NCOL_pad), lambda b, i: (0, 0)),       # M_bd (resident)
                pl.BlockSpec((K, NCOL_pad), lambda b, i: (0, 0)),       # REP  (resident)
                pl.BlockSpec((NCOL_pad, PKC), lambda b, i: (0, 0)),     # G1   (resident)
            ],
            out_specs=pl.BlockSpec((None, 1, PKC), lambda b, i: (b, 0, 0)),
            scratch_shapes=[pltpu.VMEM((1, PKC), jnp.float32)],          # f32 accumulator
        ),
        compiler_params=pltpu.CompilerParams(
            dimension_semantics=("parallel", "arbitrary")),   # batch ||, window reduce
    )(packed, M_bd, REP, G1)

    # Tiny tail (B*PK*C values): collapse packed window slots, take the mean.
    return out3.reshape(B, PK, C).sum(axis=1) * (1.0 / W)


def mccp_reference(x, weight, *, reciptive, strides, eps=1e-4):
    """Pure-JAX transcription of the PyTorch forward (for verification)."""
    C, D, R = weight.shape
    N = x.shape[1]
    weight_caps = jnp.matmul(weight, jnp.transpose(weight, (0, 2, 1)),
                             precision=_HI)
    sigma = jnp.linalg.inv(weight_caps + eps * jnp.eye(D, dtype=weight.dtype))
    results = []
    for i in range(0, N, strides):
        if i + R > N:
            inputs = jnp.concatenate([x[:, i:], x[:, :R - N + i]], axis=-1)
        else:
            inputs = x[:, i:i + R]
        out = jnp.matmul(inputs, weight.reshape(-1, R).T, precision=_HI)
        out = out.reshape(out.shape[0], C, 1, D)
        out = jnp.matmul(out, sigma, precision=_HI)
        out = jnp.matmul(out, weight.reshape(C, D, R), precision=_HI)
        out = jnp.squeeze(out, axis=2)
        out = jnp.matmul(out, inputs[:, :, None], precision=_HI)
        results.append(jnp.sqrt(out))
    results = jnp.concatenate(results, axis=-1)
    return jnp.mean(results, axis=-1)


if __name__ == "__main__":
    # Small, self-consistent configuration.
    B = 2
    in_features = 32
    num_C = 4
    num_D = 8
    reciptive = 16
    strides = 8
    eps = 1e-4

    key = jax.random.PRNGKey(0)
    k_w, k_x = jax.random.split(key)

    # reset_parameters(): uniform(-stdv, stdv) with stdv = 1/sqrt(reciptive)
    stdv = 1.0 / math.sqrt(reciptive)
    weight = jax.random.uniform(
        k_w, (num_C, num_D, reciptive), dtype=jnp.float32,
        minval=-stdv, maxval=stdv)
    x = jax.random.normal(k_x, (B, in_features), dtype=jnp.float32)

    ref = mccp_reference(x, weight, reciptive=reciptive, strides=strides,
                         eps=eps)
    ref = jax.block_until_ready(ref)

    # f32 window path: tight tolerance.
    out_f32 = mccp_forward(x, weight, reciptive=reciptive, strides=strides,
                           eps=eps, compute_dtype=jnp.float32)
    out_f32 = jax.block_until_ready(out_f32)
    np.testing.assert_allclose(np.asarray(out_f32), np.asarray(ref),
                               rtol=2e-3, atol=1e-3)

    # bf16 windows (f32 constants + f32 accumulation): halves window DMA bytes.
    out_bf16 = mccp_forward(x, weight, reciptive=reciptive, strides=strides,
                            eps=eps, compute_dtype=jnp.bfloat16)
    out_bf16 = jax.block_until_ready(out_bf16)
    np.testing.assert_allclose(np.asarray(out_bf16), np.asarray(ref),
                               rtol=5e-2, atol=5e-3)

    print("KERNEL_OK")
</pallas_src>

<mosaic_0001>
module attributes {stable_mosaic.version = 11 : i64} {
  func.func @_mccp_kernel(%arg0: i32, %arg1: i32, %arg2: memref<1x8x128xf32, #tpu.memory_space<vmem>>, %arg3: memref<128x512xf32, #tpu.memory_space<vmem>>, %arg4: memref<128x512xf32, #tpu.memory_space<vmem>>, %arg5: memref<512x32xf32, #tpu.memory_space<vmem>>, %arg6: memref<1x1x32xf32, #tpu.memory_space<vmem>>, %arg7: memref<1x32xf32, #tpu.memory_space<vmem>>) attributes {dimension_semantics = [#tpu.dimension_semantics<parallel>, #tpu.dimension_semantics<arbitrary>], iteration_bounds = array<i64: 2, 1>, scalar_prefetch = 0 : i64, scratch_operands = 1 : i64, tpu.core_type = #tpu.core_type<tc>, window_params = [{transform_indices = @transform_0, window_bounds = array<i64: 1, 8, 128>}, {pipeline_mode = #tpu.pipeline_mode<synchronous>, transform_indices = @transform_1, window_bounds = array<i64: 128, 512>}, {pipeline_mode = #tpu.pipeline_mode<synchronous>, transform_indices = @transform_2, window_bounds = array<i64: 128, 512>}, {pipeline_mode = #tpu.pipeline_mode<synchronous>, transform_indices = @transform_3, window_bounds = array<i64: 512, 32>}, {transform_indices = @transform_4, window_bounds = array<i64: 1, 1, 32>}]} {
    %c0_i32 = arith.constant 0 : i32
    %0 = arith.cmpi eq, %arg1, %c0_i32 : i32
    %1 = arith.extui %0 : i1 to i32
    %c0_i32_0 = arith.constant 0 : i32
    %2 = arith.cmpi ne, %1, %c0_i32_0 : i32
    scf.if %2 {
      %cst_19 = arith.constant 0.000000e+00 : f32
      %23 = vector.broadcast %cst_19 : f32 to vector<1x32xf32>
      %c0_20 = arith.constant 0 : index
      %c0_21 = arith.constant 0 : index
      %24 = vector.load %arg7[%c0_20, %c0_21] : memref<1x32xf32, #tpu.memory_space<vmem>>, vector<1x32xf32>
      tpu.vector_store %arg7[%c0_20, %c0_21], %23 {strides = array<i32>} : memref<1x32xf32, #tpu.memory_space<vmem>>, vector<1x32xf32>,
    } else {
    }
    %c0 = arith.constant 0 : index
    %c0_1 = arith.constant 0 : index
    %c0_2 = arith.constant 0 : index
    %3 = vector.load %arg2[%c0, %c0_1, %c0_2] : memref<1x8x128xf32, #tpu.memory_space<vmem>>, vector<1x8x128xf32>
    %4 = vector.shape_cast %3 : vector<1x8x128xf32> to vector<8x128xf32>
    %c0_3 = arith.constant 0 : index
    %c0_4 = arith.constant 0 : index
    %5 = vector.load %arg3[%c0_3, %c0_4] : memref<128x512xf32, #tpu.memory_space<vmem>>, vector<128x512xf32>
    %cst = arith.constant dense<0.000000e+00> : vector<8x512xf32>
    %6 = tpu.matmul %4, %5, %cst {dimension_numbers = #tpu.dot_dimension_numbers<[1], [0], [0], [1], [0, 0, 1, 1], [], []>} : vector<8x128xf32>, vector<128x512xf32>, vector<8x512xf32> -> vector<8x512xf32>
    %c0_5 = arith.constant 0 : index
    %c0_6 = arith.constant 0 : index
    %7 = vector.load %arg4[%c0_5, %c0_6] : memref<128x512xf32, #tpu.memory_space<vmem>>, vector<128x512xf32>
    %cst_7 = arith.constant dense<0.000000e+00> : vector<8x512xf32>
    %8 = tpu.matmul %4, %7, %cst_7 {dimension_numbers = #tpu.dot_dimension_numbers<[1], [0], [0], [1], [0, 0, 1, 1], [], []>} : vector<8x128xf32>, vector<128x512xf32>, vector<8x512xf32> -> vector<8x512xf32>
    %9 = arith.mulf %6, %8 : vector<8x512xf32>
    %c0_8 = arith.constant 0 : index
    %c0_9 = arith.constant 0 : index
    %10 = vector.load %arg5[%c0_8, %c0_9] : memref<512x32xf32, #tpu.memory_space<vmem>>, vector<512x32xf32>
    %cst_10 = arith.constant dense<0.000000e+00> : vector<8x32xf32>
    %11 = tpu.matmul %9, %10, %cst_10 {dimension_numbers = #tpu.dot_dimension_numbers<[1], [0], [0], [1], [0, 0, 1, 1], [], []>} : vector<8x512xf32>, vector<512x32xf32>, vector<8x32xf32> -> vector<8x32xf32>
    %cst_11 = arith.constant 0.000000e+00 : f32
    %12 = vector.broadcast %cst_11 : f32 to vector<8x32xf32>
    %13 = arith.maximumf %11, %12 : vector<8x32xf32>
    %14 = math.sqrt %13 : vector<8x32xf32>
    %c0_12 = arith.constant 0 : index
    %c0_13 = arith.constant 0 : index
    %15 = vector.load %arg7[%c0_12, %c0_13] : memref<1x32xf32, #tpu.memory_space<vmem>>, vector<1x32xf32>
    %cst_14 = arith.constant dense<0.000000e+00> : vector<32xf32>
    %16 = vector.multi_reduction <add>, %14, %cst_14 [0] : vector<8x32xf32> to vector<32xf32>
    %17 = vector.shape_cast %16 : vector<32xf32> to vector<1x32xf32>
    %18 = arith.addf %15, %17 : vector<1x32xf32>
    %c0_15 = arith.constant 0 : index
    %c0_16 = arith.constant 0 : index
    %19 = vector.load %arg7[%c0_15, %c0_16] : memref<1x32xf32, #tpu.memory_space<vmem>>, vector<1x32xf32>
    tpu.vector_store %arg7[%c0_15, %c0_16], %18 {strides = array<i32>} : memref<1x32xf32, #tpu.memory_space<vmem>>, vector<1x32xf32>,
    %c0_i32_17 = arith.constant 0 : i32
    %20 = arith.cmpi eq, %arg1, %c0_i32_17 : i32
    %21 = arith.extui %20 : i1 to i32
    %c0_i32_18 = arith.constant 0 : i32
    %22 = arith.cmpi ne, %21, %c0_i32_18 : i32
    scf.if %22 {
      %c0_19 = arith.constant 0 : index
      %c0_20 = arith.constant 0 : index
      %23 = vector.load %arg7[%c0_19, %c0_20] : memref<1x32xf32, #tpu.memory_space<vmem>>, vector<1x32xf32>
      %c0_21 = arith.constant 0 : index
      %c0_22 = arith.constant 0 : index
      %c0_23 = arith.constant 0 : index
      %24 = vector.load %arg6[%c0_21, %c0_22, %c0_23] : memref<1x1x32xf32, #tpu.memory_space<vmem>>, vector<1x1x32xf32>
      %25 = vector.shape_cast %24 : vector<1x1x32xf32> to vector<1x32xf32>
      %26 = vector.shape_cast %23 : vector<1x32xf32> to vector<1x1x32xf32>
      tpu.vector_store %arg6[%c0_21, %c0_22, %c0_23], %26 {strides = array<i32>} : memref<1x1x32xf32, #tpu.memory_space<vmem>>, vector<1x1x32xf32>,
    } else {
    }
    return
  }
  func.func @transform_0(%arg0: i32, %arg1: i32) -> (i32, i32, i32) {
    %c0_i32 = arith.constant 0 : i32
    %c0_i32_0 = arith.constant 0 : i32
    return %arg0, %arg1, %c0_i32 : i32, i32, i32
  }
  func.func @transform_1(%arg0: i32, %arg1: i32) -> (i32, i32) {
    %c0_i32 = arith.constant 0 : i32
    %c0_i32_0 = arith.constant 0 : i32
    %c0_i32_1 = arith.constant 0 : i32
    return %c0_i32, %c0_i32_0 : i32, i32
  }
  func.func @transform_2(%arg0: i32, %arg1: i32) -> (i32, i32) {
    %c0_i32 = arith.constant 0 : i32
    %c0_i32_0 = arith.constant 0 : i32
    %c0_i32_1 = arith.constant 0 : i32
    return %c0_i32, %c0_i32_0 : i32, i32
  }
  func.func @transform_3(%arg0: i32, %arg1: i32) -> (i32, i32) {
    %c0_i32 = arith.constant 0 : i32
    %c0_i32_0 = arith.constant 0 : i32
    %c0_i32_1 = arith.constant 0 : i32
    return %c0_i32, %c0_i32_0 : i32, i32
  }
  func.func @transform_4(%arg0: i32, %arg1: i32) -> (i32, i32, i32) {
    %c0_i32 = arith.constant 0 : i32
    %c0_i32_0 = arith.constant 0 : i32
    %c0_i32_1 = arith.constant 0 : i32
    return %arg0, %c0_i32, %c0_i32_0 : i32, i32, i32
  }
}

</mosaic_0001>

<bundles_post_ra>
// kernel: tpu_custom_call.1
= control target key start
LH: loop header
LB: loop body
LE: loop exit
PB: predicated region body
PF: predicated region fallthrough
CT: control target
= control target key end

     0   :  { %9 = vsyncpa [#allocation4], 0  ;;  %s1512_s0 = inlined_call_operand.vmem [shape: f32[2,8,128], index: 0, kind: input, shape index: {}]   ;;  %s1513_s1 = inlined_call_operand.vmem [shape: f32[128,512], index: 1, kind: input, shape index: {}]   ;;  %s1514_s2 = inlined_call_operand.hbm [shape: f32[128,512], index: 2, kind: input, shape index: {}]   ;;  %s1515_s3 = inlined_call_operand.vmem [shape: f32[512,32], index: 3, kind: input, shape index: {}]   ;;  %s1516_s4 = inlined_call_operand.hbm [shape: f32[2,1,32], index: 4, kind: output, shape index: {}]  }
   0x1   :  { %10 = vsyncpa [#allocation5], 0 }
   0x2   :  { %12 = vsyncpa [#allocation5 + $0x1], 0  ;;  %s1020_s15 = smov 0   ;;  %s1022_s16 = smov 0  }
   0x3   :  { %s1024_s17 = smov 0   ;;  %s1026_s18 = smov 0  }
   0x4   :  { %s1028_s19 = smov 0   ;;  %s1030_s20 = smov 0  }
   0x5 LB: > { %s796_s21 = sadd.s32 4294967295, %s989_s20   ;;  %s797_s22 = sadd.s32 4294967294, %s989_s20   ;;  %s989_s20 = sphi %s1030_s20, %s18_s20   ;;  %s985_s19 = sphi %s1028_s19, %s1523_s19   ;;  %s981_s18 = sphi %s1026_s18, %s1522_s18   ;;  %s977_s17 = sphi %s1024_s17, %s1521_s17   ;;  %s973_s16 = sphi %s1022_s16, %s1520_s16   ;;  %s969_s15 = sphi %s1020_s15, %s1519_s15  }
   0x6   : > { %s30_s23 = sadd.s32 1, %s985_s19  ;;  %s128_s24 = sadd.s32 1, %s977_s17 }
   0x7   : > { %p32_p0 = scmp.ge.s32.totalorder %s30_s23, 2  ;;  %p138_p1 = scmp.ne.s32.totalorder %s977_s17, %s973_s16 }
   0x8   : > { %p139_p2 = scmp.eq.s32.totalorder %s796_s21, 1  ;;  %p144_p3 = scmp.ne.s32.totalorder %s973_s16, %s969_s15 }
   0x9   : > { %s1525_s23 = smov (%p32_p0, %s30_s23), 0  ;;  %p145_p5 = scmp.eq.s32.totalorder %s797_s22, 1 }
   0xa   : > { %p1060_p4 = por %p139_p2, %p138_p1  ;;  %s125_s26 = ssub.s32 %s985_s19, %s1525_s23 }
   0xb   : > { %p798_p6 = scmp.ge.s32.totalorder %s989_s20, 1  ;;  %p126_p7 = scmp.eq.s32.totalorder %s125_s26, 0 }
   0xc   : > { %p1067_p8 = por %p145_p5, %p144_p3  ;;  %p152_p9 = scmp.lt.s32.totalorder %s989_s20, 3 }
   0xd   : > { %s1073_s28 = scalar_select %p126_p7, %s977_s17, %s128_s24  }
   0xe   : > { %p153_p10 = pnand %p798_p6, %p152_p9  ;;  %p820_p11 = scmp.eq.s32.totalorder %s796_s21, 0 }
   0xf   : > { %s166_s5 = sshll.u32 %s1514_s2, 4  ;;  %s991_s6 = smov [#allocation3]   ;;  %s167_s5 = int_to_ptr.hbm [resolvable:$true] %s166_s5 }
  0x10   : > { %p812_p12 = pneg %p153_p10  ;;  %s168_s7 = sshll.u32 %s991_s6, 4  ;;  %s169_s7 = int_to_ptr.vmem [resolvable:$true] %s168_s7 }
  0x11   : > { %s992_s8 = smov 512   ;;  %s993_s9 = smov 32  }
  0x12   : > { %p813_p13 = pnand %p820_p11, %p812_p12  ;;  %197 = sbr.rel (%p153_p10) target bundleno = 409 (0x199), region = 36 }
  0x14   : > { %815 = dma.hbm_to_vmem [thread:$0]  (!%p813_p13), %s167_s5, 8192, %s169_s7, [#allocation4], %s992_s8, %s992_s8, %s993_s9  }
  0x17   : > { %960 = dma.done.wait (%p820_p11), [#allocation4], 8192  }
  0x18   : > { %962 = vsyncadd (%p820_p11), [#allocation4], 4294959104  ;;  %v301_v0 = vld [vmem:[%s1513_s1 + $0x1f0] sm:$0xff]  ;;  %v302_v1 = vld [vmem:[%s1513_s1 + $0x1f8] sm:$0xff]  ;;  %p225_p0 = scmp.lt.s32.totalorder %s981_s18, 1  ;;  %vm236_vm0 = vcmask 253952   ;;  %s714_s26 = scalar_lea.hbm %s1516_s4, %s981_s18 }
  0x19   : > { %v299_v2 = vld [vmem:[%s1513_s1 + $0x1e0] sm:$0xff]  ;;  %343 = vmatpush.msra.mxu2 %v301_v0  ;;  %363 = vmatpush.msra.mxu3 %v302_v1  ;;  %v300_v3 = vld [vmem:[%s1513_s1 + $0x1e8] sm:$0xff]  ;;  %v297_v4 = vld [vmem:[%s1513_s1 + $0x1d0] sm:$0xff]  ;;  %vm689_vm2 = vcmask 261120   ;;  %s223_s21 = sand.u32 1, %s973_s16   ;;  %s718_s5 = sshll.u32 %s714_s26, 4  ;;  %s719_s5 = int_to_ptr.hbm [resolvable:$true] %s718_s5 }
  0x1a   : > { %v298_v5 = vld [vmem:[%s1513_s1 + $0x1d8] sm:$0xff]  ;;  %303 = vmatpush.msra.mxu0 %v299_v2  ;;  %323 = vmatpush.msra.mxu1 %v300_v3  ;;  %v295_v6 = vld [vmem:[%s1513_s1 + $0x1c0] sm:$0xff]  ;;  %v296_v7 = vld [vmem:[%s1513_s1 + $0x1c8] sm:$0xff]  ;;  %s1274_s10 = scalar_select %p225_p0, %s981_s18, 1 }
  0x1b   : > { %v293_v8 = vld [vmem:[%s1513_s1 + $0x1b0] sm:$0xff]  ;;  %344 = vmatpush.msra.mxu2 %v297_v4  ;;  %364 = vmatpush.msra.mxu3 %v298_v5  ;;  %v294_v9 = vld [vmem:[%s1513_s1 + $0x1b8] sm:$0xff]  ;;  %v291_v10 = vld [vmem:[%s1513_s1 + $0x1a0] sm:$0xff]  ;;  %s224_s29 = scalar_lea.vmem [#allocation6], %s223_s21  ;;  %s706_s6 = scalar_lea.sflag [#allocation5], %s223_s21 }
  0x1c   : > { %v292_v11 = vld [vmem:[%s1513_s1 + $0x1a8] sm:$0xff]  ;;  %304 = vmatpush.msra.mxu0 %v295_v6  ;;  %324 = vmatpush.msra.mxu1 %v296_v7  ;;  %v289_v12 = vld [vmem:[%s1513_s1 + $0x190] sm:$0xff]  ;;  %v290_v13 = vld [vmem:[%s1513_s1 + $0x198] sm:$0xff]  ;;  %s803_s11 = sshll.u32 %s1274_s10, 3  ;;  %s716_s30 = sshll.u32 %s224_s29, 4  ;;  %s717_s30 = int_to_ptr.vmem [resolvable:$true] %s716_s30 }
  0x1d   : > { %345 = vmatpush.msra.mxu2 %v293_v8  ;;  %365 = vmatpush.msra.mxu3 %v294_v9  ;;  %v287_v14 = vld [vmem:[%s1513_s1 + $0x180] sm:$0xff]  ;;  %v288_v15 = vld [vmem:[%s1513_s1 + $0x188] sm:$0xff]  ;;  %v285_v16 = vld [vmem:[%s1513_s1 + $0x170] sm:$0xff]  ;;  %s231_s14 = scalar_lea.vmem %s1512_s0, %s803_s11  ;;  %s921_s7 = sshra.s32 %s719_s5, 4  ;;  %s922_s7 = int_to_ptr.hbm [resolvable:$true] %s921_s7 }
  0x1e   : > { %305 = vmatpush.msra.mxu0 %v291_v10  ;;  %325 = vmatpush.msra.mxu1 %v292_v11  ;;  %v286_v17 = vld [vmem:[%s1513_s1 + $0x178] sm:$0xff]  ;;  %v283_v18 = vld [vmem:[%s1513_s1 + $0x160] sm:$0xff]  ;;  %v284_v19 = vld [vmem:[%s1513_s1 + $0x168] sm:$0xff]  ;;  %s923_s8 = scalar_lea.hbm %s922_s7, 1  ;;  %s927_s18 = scalar_lea.hbm %s1516_s4, 2 }
  0x1f   : > { %346 = vmatpush.msra.mxu2 %v289_v12  ;;  %366 = vmatpush.msra.mxu3 %v290_v13  ;;  %v281_v20 = vld [vmem:[%s1513_s1 + $0x150] sm:$0xff]  ;;  %v282_v21 = vld [vmem:[%s1513_s1 + $0x158] sm:$0xff]  ;;  %v279_v22 = vld [vmem:[%s1513_s1 + $0x140] sm:$0xff]  ;;  %p924_p1 = scmp.ne.s32.totalorder %s922_s7, %s923_s8  ;;  %p928_p5 = scmp.lt.s32.totalorder %s922_s7, %s1516_s4 }
  0x20   : > { %306 = vmatpush.msra.mxu0 %v287_v14  ;;  %326 = vmatpush.msra.mxu1 %v288_v15  ;;  %v280_v23 = vld [vmem:[%s1513_s1 + $0x148] sm:$0xff]  ;;  %v277_v24 = vld [vmem:[%s1513_s1 + $0x130] sm:$0xff]  ;;  %v278_v25 = vld [vmem:[%s1513_s1 + $0x138] sm:$0xff]  ;;  %p929_p6 = scmp.lt.s32.totalorder %s927_s18, %s923_s8 }
  0x21   : > { %347 = vmatpush.msra.mxu2 %v285_v16  ;;  %367 = vmatpush.msra.mxu3 %v286_v17  ;;  %v275_v26 = vld [vmem:[%s1513_s1 + $0x120] sm:$0xff]  ;;  %v276_v27 = vld [vmem:[%s1513_s1 + $0x128] sm:$0xff]  ;;  %v273_v28 = vld [vmem:[%s1513_s1 + $0x110] sm:$0xff]  ;;  %p925_p2 = pnand %p924_p1, %p1060_p4 }
  0x22   : > { %307 = vmatpush.msra.mxu0 %v283_v18  ;;  %327 = vmatpush.msra.mxu1 %v284_v19  ;;  %v274_v29 = vld [vmem:[%s1513_s1 + $0x118] sm:$0xff]  ;;  %v271_v30 = vld [vmem:[%s1513_s1 + $0x100] sm:$0xff]  ;;  %v272_v31 = vld [vmem:[%s1513_s1 + $0x108] sm:$0xff]  ;;  %p930_p7 = por %p929_p6, %p928_p5 }
  0x23   : > { %348 = vmatpush.msra.mxu2 %v281_v20  ;;  %368 = vmatpush.msra.mxu3 %v282_v21  ;;  %v269_v32 = vld [vmem:[%s1513_s1 + $0xf0] sm:$0xff]  ;;  %v270_v33 = vld [vmem:[%s1513_s1 + $0xf8] sm:$0xff]  ;;  %v267_v34 = vld [vmem:[%s1513_s1 + $0xe0] sm:$0xff]  ;;  %p926_p3 = pneg %p925_p2 }
  0x24   : > { %308 = vmatpush.msra.mxu0 %v279_v22  ;;  %328 = vmatpush.msra.mxu1 %v280_v23  ;;  %v268_v35 = vld [vmem:[%s1513_s1 + $0xe8] sm:$0xff]  ;;  %v265_v36 = vld [vmem:[%s1513_s1 + $0xd0] sm:$0xff]  ;;  %v266_v37 = vld [vmem:[%s1513_s1 + $0xd8] sm:$0xff] }
  0x25   : > { %349 = vmatpush.msra.mxu2 %v277_v24  ;;  %369 = vmatpush.msra.mxu3 %v278_v25  ;;  %v263_v38 = vld [vmem:[%s1513_s1 + $0xc0] sm:$0xff]  ;;  %v264_v39 = vld [vmem:[%s1513_s1 + $0xc8] sm:$0xff]  ;;  %v261_v40 = vld [vmem:[%s1513_s1 + $0xb0] sm:$0xff]  ;;  %p931_p9 = pnand %p930_p7, %p926_p3 }
  0x26   : > { %309 = vmatpush.msra.mxu0 %v275_v26  ;;  %329 = vmatpush.msra.mxu1 %v276_v27  ;;  %v262_v41 = vld [vmem:[%s1513_s1 + $0xb8] sm:$0xff]  ;;  %v259_v42 = vld [vmem:[%s1513_s1 + $0xa0] sm:$0xff]  ;;  %v260_v43 = vld [vmem:[%s1513_s1 + $0xa8] sm:$0xff] }
  0x27   : > { %350 = vmatpush.msra.mxu2 %v273_v28  ;;  %370 = vmatpush.msra.mxu3 %v274_v29  ;;  %v257_v44 = vld [vmem:[%s1513_s1 + $0x90] sm:$0xff]  ;;  %v258_v45 = vld [vmem:[%s1513_s1 + $0x98] sm:$0xff]  ;;  %v255_v46 = vld [vmem:[%s1513_s1 + $0x80] sm:$0xff] }
  0x28   : > { %310 = vmatpush.msra.mxu0 %v271_v30  ;;  %330 = vmatpush.msra.mxu1 %v272_v31  ;;  %v256_v47 = vld [vmem:[%s1513_s1 + $0x88] sm:$0xff]  ;;  %v253_v48 = vld [vmem:[%s1513_s1 + $0x70] sm:$0xff]  ;;  %v254_v49 = vld [vmem:[%s1513_s1 + $0x78] sm:$0xff] }
  0x29   : > { %351 = vmatpush.msra.mxu2 %v269_v32  ;;  %371 = vmatpush.msra.mxu3 %v270_v33  ;;  %v251_v50 = vld [vmem:[%s1513_s1 + $0x60] sm:$0xff]  ;;  %v252_v51 = vld [vmem:[%s1513_s1 + $0x68] sm:$0xff]  ;;  %v249_v52 = vld [vmem:[%s1513_s1 + $0x50] sm:$0xff] }
  0x2a   : > { %311 = vmatpush.msra.mxu0 %v267_v34  ;;  %331 = vmatpush.msra.mxu1 %v268_v35  ;;  %v250_v53 = vld [vmem:[%s1513_s1 + $0x58] sm:$0xff]  ;;  %v247_v54 = vld [vmem:[%s1513_s1 + $0x40] sm:$0xff]  ;;  %v248_v55 = vld [vmem:[%s1513_s1 + $0x48] sm:$0xff] }
  0x2b   : > { %352 = vmatpush.msra.mxu2 %v265_v36  ;;  %372 = vmatpush.msra.mxu3 %v266_v37  ;;  %v245_v56 = vld [vmem:[%s1513_s1 + $0x30] sm:$0xff]  ;;  %v246_v57 = vld [vmem:[%s1513_s1 + $0x38] sm:$0xff]  ;;  %v243_v58 = vld [vmem:[%s1513_s1 + $0x20] sm:$0xff] }
  0x2c   : > { %312 = vmatpush.msra.mxu0 %v263_v38  ;;  %332 = vmatpush.msra.mxu1 %v264_v39  ;;  %v244_v59 = vld [vmem:[%s1513_s1 + $0x28] sm:$0xff]  ;;  %v241_v60 = vld [vmem:[%s1513_s1 + $0x10] sm:$0xff]  ;;  %v242_v61 = vld [vmem:[%s1513_s1 + $0x18] sm:$0xff] }
  0x2d   : > { %353 = vmatpush.msra.mxu2 %v261_v40  ;;  %373 = vmatpush.msra.mxu3 %v262_v41  ;;  %v445_v62 = vld [vmem:[#allocation3 + $0x1f0] sm:$0xff]  ;;  %v446_v63 = vld [vmem:[#allocation3 + $0x1f8] sm:$0xff]  ;;  %v240_v1 = vld [vmem:[%s1513_s1 + $0x8] sm:$0xff] }
  0x2e   : > { %313 = vmatpush.msra.mxu0 %v259_v42  ;;  %333 = vmatpush.msra.mxu1 %v260_v43  ;;  %v239_v0 = vld [vmem:[%s1513_s1] sm:$0xff]  ;;  %v444_v3 = vld [vmem:[#allocation3 + $0x1e8] sm:$0xff]  ;;  %v441_v4 = vld [vmem:[#allocation3 + $0x1d0] sm:$0xff] }
  0x2f   : > { %354 = vmatpush.msra.mxu2 %v257_v44  ;;  %374 = vmatpush.msra.mxu3 %v258_v45  ;;  %v443_v2 = vld [vmem:[#allocation3 + $0x1e0] sm:$0xff]  ;;  %v442_v5 = vld [vmem:[#allocation3 + $0x1d8] sm:$0xff]  ;;  %v440_v7 = vld [vmem:[#allocation3 + $0x1c8] sm:$0xff] }
  0x30   : > { %314 = vmatpush.msra.mxu0 %v255_v46  ;;  %334 = vmatpush.msra.mxu1 %v256_v47  ;;  %v439_v6 = vld [vmem:[#allocation3 + $0x1c0] sm:$0xff]  ;;  %v437_v8 = vld [vmem:[#allocation3 + $0x1b0] sm:$0xff]  ;;  %v438_v9 = vld [vmem:[#allocation3 + $0x1b8] sm:$0xff] }
  0x31   : > { %355 = vmatpush.msra.mxu2 %v253_v48  ;;  %375 = vmatpush.msra.mxu3 %v254_v49  ;;  %v435_v10 = vld [vmem:[#allocation3 + $0x1a0] sm:$0xff]  ;;  %v436_v11 = vld [vmem:[#allocation3 + $0x1a8] sm:$0xff]  ;;  %v433_v12 = vld [vmem:[#allocation3 + $0x190] sm:$0xff] }
  0x32   : > { %315 = vmatpush.msra.mxu0 %v251_v50  ;;  %335 = vmatpush.msra.mxu1 %v252_v51  ;;  %v434_v13 = vld [vmem:[#allocation3 + $0x198] sm:$0xff]  ;;  %v431_v14 = vld [vmem:[#allocation3 + $0x180] sm:$0xff]  ;;  %v432_v15 = vld [vmem:[#allocation3 + $0x188] sm:$0xff] }
  0x33   : > { %356 = vmatpush.msra.mxu2 %v249_v52  ;;  %376 = vmatpush.msra.mxu3 %v250_v53  ;;  %v429_v16 = vld [vmem:[#allocation3 + $0x170] sm:$0xff]  ;;  %v430_v17 = vld [vmem:[#allocation3 + $0x178] sm:$0xff]  ;;  %v427_v18 = vld [vmem:[#allocation3 + $0x160] sm:$0xff] }
  0x34   : > { %316 = vmatpush.msra.mxu0 %v247_v54  ;;  %336 = vmatpush.msra.mxu1 %v248_v55  ;;  %v428_v19 = vld [vmem:[#allocation3 + $0x168] sm:$0xff]  ;;  %v425_v20 = vld [vmem:[#allocation3 + $0x150] sm:$0xff]  ;;  %v426_v21 = vld [vmem:[#allocation3 + $0x158] sm:$0xff] }
  0x35   : > { %357 = vmatpush.msra.mxu2 %v245_v56  ;;  %377 = vmatpush.msra.mxu3 %v246_v57  ;;  %v423_v22 = vld [vmem:[#allocation3 + $0x140] sm:$0xff]  ;;  %v424_v23 = vld [vmem:[#allocation3 + $0x148] sm:$0xff]  ;;  %v421_v24 = vld [vmem:[#allocation3 + $0x130] sm:$0xff] }
  0x36   : > { %317 = vmatpush.msra.mxu0 %v243_v58  ;;  %337 = vmatpush.msra.mxu1 %v244_v59  ;;  %v422_v25 = vld [vmem:[#allocation3 + $0x138] sm:$0xff]  ;;  %v419_v26 = vld [vmem:[#allocation3 + $0x120] sm:$0xff]  ;;  %v420_v27 = vld [vmem:[#allocation3 + $0x128] sm:$0xff] }
  0x37   : > { %358 = vmatpush.msra.mxu2 %v241_v60  ;;  %378 = vmatpush.msra.mxu3 %v242_v61  ;;  %v417_v28 = vld [vmem:[#allocation3 + $0x110] sm:$0xff]  ;;  %v418_v29 = vld [vmem:[#allocation3 + $0x118] sm:$0xff]  ;;  %v415_v30 = vld [vmem:[#allocation3 + $0x100] sm:$0xff] }
  0x38   : > { %318 = vmatpush.msra.mxu0 %v239_v0  ;;  %338 = vmatpush.msra.mxu1 %v240_v1  ;;  %v416_v31 = vld [vmem:[#allocation3 + $0x108] sm:$0xff]  ;;  %v413_v32 = vld [vmem:[#allocation3 + $0xf0] sm:$0xff]  ;;  %v414_v33 = vld [vmem:[#allocation3 + $0xf8] sm:$0xff] }
  0x39   : > { %487 = vmatpush.msrb.mxu2 %v445_v62  ;;  %507 = vmatpush.msrb.mxu3 %v446_v63  ;;  %v411_v34 = vld [vmem:[#allocation3 + $0xe0] sm:$0xff]  ;;  %v412_v35 = vld [vmem:[#allocation3 + $0xe8] sm:$0xff]  ;;  %v409_v36 = vld [vmem:[#allocation3 + $0xd0] sm:$0xff] }
  0x3a   : > { %447 = vmatpush.msrb.mxu0 %v443_v2  ;;  %467 = vmatpush.msrb.mxu1 %v444_v3  ;;  %v410_v37 = vld [vmem:[#allocation3 + $0xd8] sm:$0xff]  ;;  %v407_v38 = vld [vmem:[#allocation3 + $0xc0] sm:$0xff]  ;;  %v408_v39 = vld [vmem:[#allocation3 + $0xc8] sm:$0xff] }
  0x3b   : > { %488 = vmatpush.msrb.mxu2 %v441_v4  ;;  %508 = vmatpush.msrb.mxu3 %v442_v5  ;;  %v405_v40 = vld [vmem:[#allocation3 + $0xb0] sm:$0xff]  ;;  %v406_v41 = vld [vmem:[#allocation3 + $0xb8] sm:$0xff]  ;;  %v403_v42 = vld [vmem:[#allocation3 + $0xa0] sm:$0xff] }
  0x3c   : > { %448 = vmatpush.msrb.mxu0 %v439_v6  ;;  %468 = vmatpush.msrb.mxu1 %v440_v7  ;;  %v404_v43 = vld [vmem:[#allocation3 + $0xa8] sm:$0xff]  ;;  %v401_v44 = vld [vmem:[#allocation3 + $0x90] sm:$0xff]  ;;  %v402_v45 = vld [vmem:[#allocation3 + $0x98] sm:$0xff] }
  0x3d   : > { %489 = vmatpush.msrb.mxu2 %v437_v8  ;;  %509 = vmatpush.msrb.mxu3 %v438_v9  ;;  %v238_v46 = vld [vmem:[%s231_s14] sm:$0xff]  ;;  %v400_v48 = vld [vmem:[#allocation3 + $0x88] sm:$0xff]  ;;  %v397_v49 = vld [vmem:[#allocation3 + $0x70] sm:$0xff] }
  0x3e   : > { %449 = vmatpush.msrb.mxu0 %v435_v10  ;;  %469 = vmatpush.msrb.mxu1 %v436_v11  ;;  %v399_v47 = vld [vmem:[#allocation3 + $0x80] sm:$0xff]  ;;  %v398_v50 = vld [vmem:[#allocation3 + $0x78] sm:$0xff]  ;;  %v396_v52 = vld [vmem:[#allocation3 + $0x68] sm:$0xff] }
  0x3f   : > { %490 = vmatpush.msrb.mxu2 %v433_v12  ;;  %510 = vmatpush.msrb.mxu3 %v434_v13  ;;  %v395_v51 = vld [vmem:[#allocation3 + $0x60] sm:$0xff]  ;;  %v393_v53 = vld [vmem:[#allocation3 + $0x50] sm:$0xff]  ;;  %v394_v54 = vld [vmem:[#allocation3 + $0x58] sm:$0xff] }
  0x40   : > { %450 = vmatpush.msrb.mxu0 %v431_v14  ;;  %470 = vmatpush.msrb.mxu1 %v432_v15  ;;  %v391_v55 = vld [vmem:[#allocation3 + $0x40] sm:$0xff]  ;;  %v392_v56 = vld [vmem:[#allocation3 + $0x48] sm:$0xff]  ;;  %v389_v57 = vld [vmem:[#allocation3 + $0x30] sm:$0xff] }
  0x41   : > { %491 = vmatpush.msrb.mxu2 %v429_v16  ;;  %511 = vmatpush.msrb.mxu3 %v430_v17  ;;  %v390_v58 = vld [vmem:[#allocation3 + $0x38] sm:$0xff]  ;;  %v387_v59 = vld [vmem:[#allocation3 + $0x20] sm:$0xff]  ;;  %v388_v60 = vld [vmem:[#allocation3 + $0x28] sm:$0xff] }
  0x42   : > { %451 = vmatpush.msrb.mxu0 %v427_v18  ;;  %471 = vmatpush.msrb.mxu1 %v428_v19  ;;  %v385_v61 = vld [vmem:[#allocation3 + $0x10] sm:$0xff]  ;;  %v386_v62 = vld [vmem:[#allocation3 + $0x18] sm:$0xff]  ;;  %v383_v63 = vld [vmem:[#allocation3] sm:$0xff] }
  0x43   : > { %492 = vmatpush.msrb.mxu2 %v425_v20  ;;  %512 = vmatpush.msrb.mxu3 %v426_v21  ;;  %v384_v0 = vld [vmem:[#allocation3 + $0x8] sm:$0xff]  ;;  %v546_v1 = vld [vmem:[%s1515_s3 + $0x78] sm:$0xff]  ;;  %v543_v13 = vld [vmem:[%s1515_s3 + $0x60] sm:$0xff] }
  0x44   : > { %452 = vmatpush.msrb.mxu0 %v423_v22  ;;  %472 = vmatpush.msrb.mxu1 %v424_v23  ;;  %v562_v2 = vld [vmem:[%s1515_s3 + $0xf8] sm:$0xff]  ;;  %v545_v5 = vld [vmem:[%s1515_s3 + $0x70] sm:$0xff]  ;;  %v544_v9 = vld [vmem:[%s1515_s3 + $0x68] sm:$0xff] }
  0x45   : > { %493 = vmatpush.msrb.mxu2 %v421_v24  ;;  %513 = vmatpush.msrb.mxu3 %v422_v25  ;;  %v578_v3 = vld [vmem:[%s1515_s3 + $0x178] sm:$0xff]  ;;  %v561_v6 = vld [vmem:[%s1515_s3 + $0xf0] sm:$0xff]  ;;  %v560_v10 = vld [vmem:[%s1515_s3 + $0xe8] sm:$0xff] }
  0x46   : > { %453 = vmatpush.msrb.mxu0 %v419_v26  ;;  %473 = vmatpush.msrb.mxu1 %v420_v27  ;;  %v594_v4 = vld [vmem:[%s1515_s3 + $0x1f8] sm:$0xff]  ;;  %v577_v7 = vld [vmem:[%s1515_s3 + $0x170] sm:$0xff]  ;;  %v576_v11 = vld [vmem:[%s1515_s3 + $0x168] sm:$0xff] }
  0x47   : > { %494 = vmatpush.msrb.mxu2 %v417_v28  ;;  %514 = vmatpush.msrb.mxu3 %v418_v29  ;;  %v593_v8 = vld [vmem:[%s1515_s3 + $0x1f0] sm:$0xff]  ;;  %v592_v12 = vld [vmem:[%s1515_s3 + $0x1e8] sm:$0xff]  ;;  %v559_v14 = vld [vmem:[%s1515_s3 + $0xe0] sm:$0xff] }
  0x48   : > { %454 = vmatpush.msrb.mxu0 %v415_v30  ;;  %474 = vmatpush.msrb.mxu1 %v416_v31  ;;  %v575_v15 = vld [vmem:[%s1515_s3 + $0x160] sm:$0xff]  ;;  %v542_v17 = vld [vmem:[%s1515_s3 + $0x58] sm:$0xff]  ;;  %v541_v21 = vld [vmem:[%s1515_s3 + $0x50] sm:$0xff] }
  0x49   : > { %495 = vmatpush.msrb.mxu2 %v413_v32  ;;  %515 = vmatpush.msrb.mxu3 %v414_v33  ;;  %v591_v16 = vld [vmem:[%s1515_s3 + $0x1e0] sm:$0xff]  ;;  %v558_v18 = vld [vmem:[%s1515_s3 + $0xd8] sm:$0xff]  ;;  %v557_v22 = vld [vmem:[%s1515_s3 + $0xd0] sm:$0xff] }
  0x4a   : > { %455 = vmatpush.msrb.mxu0 %v411_v34  ;;  %475 = vmatpush.msrb.mxu1 %v412_v35  ;;  %v574_v19 = vld [vmem:[%s1515_s3 + $0x158] sm:$0xff]  ;;  %v573_v23 = vld [vmem:[%s1515_s3 + $0x150] sm:$0xff]  ;;  %v540_v25 = vld [vmem:[%s1515_s3 + $0x48] sm:$0xff] }
  0x4b   : > { %496 = vmatpush.msrb.mxu2 %v409_v36  ;;  %516 = vmatpush.msrb.mxu3 %v410_v37  ;;  %v590_v20 = vld [vmem:[%s1515_s3 + $0x1d8] sm:$0xff]  ;;  %v589_v24 = vld [vmem:[%s1515_s3 + $0x1d0] sm:$0xff]  ;;  %v556_v26 = vld [vmem:[%s1515_s3 + $0xc8] sm:$0xff] }
  0x4c   : > { %456 = vmatpush.msrb.mxu0 %v407_v38  ;;  %476 = vmatpush.msrb.mxu1 %v408_v39  ;;  %v572_v27 = vld [vmem:[%s1515_s3 + $0x148] sm:$0xff]  ;;  %v539_v29 = vld [vmem:[%s1515_s3 + $0x40] sm:$0xff]  ;;  %v538_v33 = vld [vmem:[%s1515_s3 + $0x38] sm:$0xff] }
  0x4d   : > { %497 = vmatpush.msrb.mxu2 %v405_v40  ;;  %517 = vmatpush.msrb.mxu3 %v406_v41  ;;  %v588_v28 = vld [vmem:[%s1515_s3 + $0x1c8] sm:$0xff]  ;;  %v555_v30 = vld [vmem:[%s1515_s3 + $0xc0] sm:$0xff]  ;;  %v554_v34 = vld [vmem:[%s1515_s3 + $0xb8] sm:$0xff] }
  0x4e   : > { %457 = vmatpush.msrb.mxu0 %v403_v42  ;;  %477 = vmatpush.msrb.mxu1 %v404_v43  ;;  %v571_v31 = vld [vmem:[%s1515_s3 + $0x140] sm:$0xff]  ;;  %v537_v35 = vld [vmem:[%s1515_s3 + $0x30] sm:$0xff]  ;;  %v536_v37 = vld [vmem:[%s1515_s3 + $0x28] sm:$0xff] }
  0x4f   : > { %498 = vmatpush.msrb.mxu2 %v401_v44  ;;  %518 = vmatpush.msrb.mxu3 %v402_v45  ;;  %v587_v32 = vld [vmem:[%s1515_s3 + $0x1c0] sm:$0xff]  ;;  %v553_v36 = vld [vmem:[%s1515_s3 + $0xb0] sm:$0xff]  ;;  %v552_v38 = vld [vmem:[%s1515_s3 + $0xa8] sm:$0xff] }
  0x50   : > { %359 = vmatmul.f32.vlgmr.msra.gmra.mxu2 %v238_v46  ;;  %379 = vmatmul.f32.vlgmr.msra.gmra.mxu3 %v238_v46  ;;  %v570_v39 = vld [vmem:[%s1515_s3 + $0x138] sm:$0xff]  ;;  %v535_v41 = vld [vmem:[%s1515_s3 + $0x20] sm:$0xff]  ;;  %v569_v43 = vld [vmem:[%s1515_s3 + $0x130] sm:$0xff] }
  0x51   : > { %458 = vmatpush.msrb.mxu0 %v399_v47  ;;  %478 = vmatpush.msrb.mxu1 %v400_v48  ;;  %v586_v40 = vld [vmem:[%s1515_s3 + $0x1b8] sm:$0xff]  ;;  %v551_v42 = vld [vmem:[%s1515_s3 + $0xa0] sm:$0xff]  ;;  %v585_v44 = vld [vmem:[%s1515_s3 + $0x1b0] sm:$0xff] }
  0x52   : > { %499 = vmatpush.msrb.mxu2 %v397_v49  ;;  %519 = vmatpush.msrb.mxu3 %v398_v50  ;;  %v534_v45 = vld [vmem:[%s1515_s3 + $0x18] sm:$0xff]  ;;  %v568_v47 = vld [vmem:[%s1515_s3 + $0x128] sm:$0xff]  ;;  %v533_v49 = vld [vmem:[%s1515_s3 + $0x10] sm:$0xff] }
  0x53   : > { %319 = vmatmul.f32.vlgmr.msra.gmra.mxu0 %v238_v46  ;;  %339 = vmatmul.f32.vlgmr.msra.gmra.mxu1 %v238_v46  ;;  %v584_v48 = vld [vmem:[%s1515_s3 + $0x1a8] sm:$0xff]  ;;  %v549_v50 = vld [vmem:[%s1515_s3 + $0x90] sm:$0xff] }
  0x54   : > { %459 = vmatpush.msrb.mxu0 %v395_v51  ;;  %479 = vmatpush.msrb.mxu1 %v396_v52  ;;  %v567_v51 = vld [vmem:[%s1515_s3 + $0x120] sm:$0xff] }
  0x55   : > { %500 = vmatpush.msrb.mxu2 %v393_v53  ;;  %520 = vmatpush.msrb.mxu3 %v394_v54  ;;  %v583_v52 = vld [vmem:[%s1515_s3 + $0x1a0] sm:$0xff]  ;;  %v532_v53 = vld [vmem:[%s1515_s3 + $0x8] sm:$0xff] }
  0x56   : > { %460 = vmatpush.msrb.mxu0 %v391_v55  ;;  %480 = vmatpush.msrb.mxu1 %v392_v56  ;;  %v548_v54 = vld [vmem:[%s1515_s3 + $0x88] sm:$0xff]  ;;  %v566_v55 = vld [vmem:[%s1515_s3 + $0x118] sm:$0xff] }
  0x57   : > { %501 = vmatpush.msrb.mxu2 %v389_v57  ;;  %521 = vmatpush.msrb.mxu3 %v390_v58  ;;  %v582_v56 = vld [vmem:[%s1515_s3 + $0x198] sm:$0xff]  ;;  %v531_v57 = vld [vmem:[%s1515_s3] sm:$0xff] }
  0x58   : > { %461 = vmatpush.msrb.mxu0 %v387_v59  ;;  %481 = vmatpush.msrb.mxu1 %v388_v60  ;;  %v547_v58 = vld [vmem:[%s1515_s3 + $0x80] sm:$0xff]  ;;  %v565_v59 = vld [vmem:[%s1515_s3 + $0x110] sm:$0xff] }
  0x59   : > { %502 = vmatpush.msrb.mxu2 %v385_v61  ;;  %522 = vmatpush.msrb.mxu3 %v386_v62  ;;  %v581_v60 = vld [vmem:[%s1515_s3 + $0x190] sm:$0xff]  ;;  %v564_v61 = vld [vmem:[%s1515_s3 + $0x108] sm:$0xff] }
  0x5a   : > { %503 = vmatmul.f32.vlgmr.msrb.gmra.mxu2 %v238_v46  ;;  %523 = vmatmul.f32.vlgmr.msrb.gmra.mxu3 %v238_v46  ;;  %v580_v62 = vld [vmem:[%s1515_s3 + $0x188] sm:$0xff] }
  0x5b   : > { %462 = vmatpush.msrb.mxu0 %v383_v63  ;;  %482 = vmatpush.msrb.mxu1 %v384_v0  ;;  %v563_v63 = vld [vmem:[%s1515_s3 + $0x100] sm:$0xff] }
  0x5c   : > { %463 = vmatmul.f32.vlgmr.msrb.gmra.mxu0 %v238_v46  ;;  %483 = vmatmul.f32.vlgmr.msrb.gmra.mxu1 %v238_v46  ;;  %v550_v46 = vld [vmem:[%s1515_s3 + $0x98] sm:$0xff]  ;;  %v579_v0 = vld [vmem:[%s1515_s3 + $0x180] sm:$0xff] }
  0x5d   : > { %595 = vmatpush.msra.mxu0 %v546_v1  ;;  %615 = vmatpush.msra.mxu1 %v562_v2 }
  0x5e   : > { %635 = vmatpush.msra.mxu2 %v578_v3  ;;  %655 = vmatpush.msra.mxu3 %v594_v4 }
  0x5f   : > { %596 = vmatpush.msra.mxu0 %v545_v5  ;;  %616 = vmatpush.msra.mxu1 %v561_v6 }
  0x60   : > { %636 = vmatpush.msra.mxu2 %v577_v7  ;;  %656 = vmatpush.msra.mxu3 %v593_v8 }
  0x61   : > { %597 = vmatpush.msra.mxu0 %v544_v9  ;;  %617 = vmatpush.msra.mxu1 %v560_v10 }
  0x62   : > { %637 = vmatpush.msra.mxu2 %v576_v11  ;;  %657 = vmatpush.msra.mxu3 %v592_v12 }
  0x63   : > { %598 = vmatpush.msra.mxu0 %v543_v13  ;;  %618 = vmatpush.msra.mxu1 %v559_v14 }
  0x64   : > { %638 = vmatpush.msra.mxu2 %v575_v15  ;;  %658 = vmatpush.msra.mxu3 %v591_v16  ;;  %v994_v15 = vmov 0.0  }
  0x65   : > { %599 = vmatpush.msra.mxu0 %v542_v17  ;;  %619 = vmatpush.msra.mxu1 %v558_v18  ;;  %237 = vst.msk [vmem:[#allocation2] sm:$0x1] %vm236_vm0, %v994_v15 }
  0x66   : > { %639 = vmatpush.msra.mxu2 %v574_v19  ;;  %659 = vmatpush.msra.mxu3 %v590_v20 }
  0x67   : > { %600 = vmatpush.msra.mxu0 %v541_v21  ;;  %620 = vmatpush.msra.mxu1 %v557_v22 }
  0x68   : > { %640 = vmatpush.msra.mxu2 %v573_v23  ;;  %660 = vmatpush.msra.mxu3 %v589_v24 }
  0x69   : > { %601 = vmatpush.msra.mxu0 %v540_v25  ;;  %621 = vmatpush.msra.mxu1 %v556_v26 }
  0x6a   : > { %641 = vmatpush.msra.mxu2 %v572_v27  ;;  %661 = vmatpush.msra.mxu3 %v588_v28 }
  0x6b   : > { %602 = vmatpush.msra.mxu0 %v539_v29  ;;  %622 = vmatpush.msra.mxu1 %v555_v30 }
  0x6c   : > { %642 = vmatpush.msra.mxu2 %v571_v31  ;;  %662 = vmatpush.msra.mxu3 %v587_v32 }
  0x6d   : > { %603 = vmatpush.msra.mxu0 %v538_v33  ;;  %623 = vmatpush.msra.mxu1 %v554_v34 }
  0x6e   : > { %643 = vmatpush.msra.mxu2 %v570_v39  ;;  %663 = vmatpush.msra.mxu3 %v586_v40 }
  0x6f   : > { %604 = vmatpush.msra.mxu0 %v537_v35  ;;  %624 = vmatpush.msra.mxu1 %v553_v36 }
  0x70   : > { %644 = vmatpush.msra.mxu2 %v569_v43  ;;  %664 = vmatpush.msra.mxu3 %v585_v44 }
  0x71   : > { %605 = vmatpush.msra.mxu0 %v536_v37  ;;  %625 = vmatpush.msra.mxu1 %v552_v38  ;;  %v688_v38 = vld [vmem:[#allocation2] sm:$0x1] }
  0x72   : > { %645 = vmatpush.msra.mxu2 %v568_v47  ;;  %665 = vmatpush.msra.mxu3 %v584_v48 }
  0x73   : > { %606 = vmatpush.msra.mxu0 %v535_v41  ;;  %626 = vmatpush.msra.mxu1 %v551_v42 }
  0x74   : > { %646 = vmatpush.msra.mxu2 %v567_v51  ;;  %666 = vmatpush.msra.mxu3 %v583_v52 }
  0x75   : > { %607 = vmatpush.msra.mxu0 %v534_v45  ;;  %627 = vmatpush.msra.mxu1 %v550_v46 }
  0x76   : > { %647 = vmatpush.msra.mxu2 %v566_v55  ;;  %667 = vmatpush.msra.mxu3 %v582_v56 }
  0x77   : > { %608 = vmatpush.msra.mxu0 %v533_v49  ;;  %628 = vmatpush.msra.mxu1 %v549_v50 }
  0x78   : > { %648 = vmatpush.msra.mxu2 %v565_v59  ;;  %668 = vmatpush.msra.mxu3 %v581_v60 }
  0x79   : > { %609 = vmatpush.msra.mxu0 %v532_v53  ;;  %629 = vmatpush.msra.mxu1 %v548_v54 }
  0x7a   : > { %649 = vmatpush.msra.mxu2 %v564_v61  ;;  %669 = vmatpush.msra.mxu3 %v580_v62 }
  0x7b   : > { %610 = vmatpush.msra.mxu0 %v531_v57  ;;  %630 = vmatpush.msra.mxu1 %v547_v58 }
  0x7c   : > { %650 = vmatpush.msra.mxu2 %v563_v63  ;;  %670 = vmatpush.msra.mxu3 %v579_v0 }
  0xd0   : > { %v320_v1 = vpop.f32.mrf.mxu0  ;;  %v340_v2 = vpop.f32.mrf.mxu1 }
  0xd3   : > { %v360_v3 = vpop.f32.mrf.mxu2  ;;  %v380_v4 = vpop.f32.mrf.mxu3 }
  0xd9   : > { %v464_v5 = vpop.f32.mrf.mxu0  ;;  %v484_v6 = vpop.f32.mrf.mxu1 }
  0xda   : > { %v527_v7 = vmul.f32 %v464_v5, %v320_v1  ;;  %v528_v8 = vmul.f32 %v484_v6, %v340_v2 }
  0xdc   : > { %611 = vmatmul.f32.vlgmr.msra.gmra.mxu0 %v527_v7  ;;  %631 = vmatmul.f32.vlgmr.msra.gmra.mxu1 %v528_v8 }
  0xdd   : > { %v504_v9 = vpop.f32.mrf.mxu2  ;;  %v524_v10 = vpop.f32.mrf.mxu3 }
  0xde   : > { %v529_v11 = vmul.f32 %v504_v9, %v360_v3  ;;  %v530_v12 = vmul.f32 %v524_v10, %v380_v4 }
  0xe0   : > { %651 = vmatmul.f32.vlgmr.msra.gmra.mxu2 %v529_v11  ;;  %671 = vmatmul.f32.vlgmr.msra.gmra.mxu3 %v530_v12 }
 0x159   : > { %v612_v13 = vpop.f32.mrf.mxu0  ;;  %v632_v14 = vpop.f32.mrf.mxu1 }
 0x15a   : > { %v633_v16 = vadd.f32 %v632_v14, %v612_v13 }
 0x163   : > { %v652_v17 = vpop.f32.mrf.mxu2  ;;  %v672_v19 = vpop.f32.mrf.mxu3 }
 0x164   : > { %v653_v18 = vadd.f32 %v652_v17, %v633_v16 }
 0x166   : > { %v673_v20 = vadd.f32 %v672_v19, %v653_v18 }
 0x168   : > { %v675_v21 = vmax.f32 %v673_v20, 0.0 }
 0x16a   : > { %875 = vrsqrt.f32 %v675_v21  ;;  %vm683_vm1 = vcmp.eq.f32.partialorder %v675_v21, inf  ;;  %v686_v29 = vand.u32 2147483648, %v675_v21  ;;  %vm685_vm3 = vcmp.eq.f32.partialorder %v675_v21, 0.0 }
 0x170   : > { %v876_v22 = vpop.eup %875 }
 0x171   : > { %v677_v23 = vmul.f32 %v876_v22, %v675_v21 }
 0x173   : > { %v678_v24 = vmul.f32 %v876_v22, %v677_v23 }
 0x175   : > { %v679_v25 = vmul.f32 0.5, %v678_v24 }
 0x177   : > { %v680_v26 = vsub.f32 1.5, %v679_v25 }
 0x179   : > { %v681_v27 = vmul.f32 %v876_v22, %v680_v26 }
 0x17b   : > { %v682_v28 = vmul.f32 %v681_v27, %v675_v21 }
 0x17d   : > { %v684_v30 = vsel %vm683_vm1, %v675_v21, %v682_v28 }
 0x17e   : > { %v687_v31 = vsel %vm685_vm3, %v686_v29, %v684_v30 }
 0x17f   : > { %v690_v32 = vsel %vm689_vm2, %v687_v31, 0.0 }
 0x180   : > { %v691_v33 = vrot.slane %v690_v32, 4 }
 0x182   : > { %v692_v34 = vadd.f32 %v691_v33, %v690_v32 }
 0x184   : > { %v693_v35 = vrot.slane %v692_v34, 2 }
 0x186   : > { %v694_v36 = vadd.f32 %v693_v35, %v692_v34 }
 0x188   : > { %v695_v37 = vrot.slane %v694_v36, 1 }
 0x18a   : > { %v696_v39 = vadd.f32 %v695_v37, %v694_v36 }
 0x18c   : > { %v697_v40 = vadd.f32 %v696_v39, %v688_v38 }
 0x18e   : > { %699 = vst.msk [vmem:[#allocation2] sm:$0x1] %vm236_vm0, %v697_v40 }
 0x195   : > { %v703_v41 = vld [vmem:[#allocation2] sm:$0x1] }
 0x196   : > { %704 = vst.msk [vmem:[%s224_s29] sm:$0x1] %vm236_vm0, %v703_v41 }
 0x197   : > { %934 = shalt.err (!%p931_p9)
}
 0x198   : > { %810 = dma.vmem_to_hbm [thread:$0]  (%p1060_p4), %s717_s30, 16, %s719_s5, %s706_s6  }
 0x199 PF: > { %p822_p10 = scmp.ge.s32.totalorder %s989_s20, 2  ;;  %s730_s13 = sand.u32 1, %s969_s15  }
 0x19a   : > { %s731_s14 = scalar_lea.sflag [#allocation5], %s730_s13 }
 0x19b   : > { %p817_p11 = pnand %p822_p10, %p1067_p8 }
 0x19d   : > { %p818_p12 = pneg %p817_p11 }
 0x19f   : > { %964 = dma.done.wait (%p818_p12), %s731_s14, 16  }
 0x1a0   : > { %966 = vsyncadd (%p818_p12), %s731_s14, 4294967280  ;;  %s18_s20 = sadd.s32 1, %s989_s20   ;;  %s1519_s15 = smov %s973_s16 }
 0x1a1   : > { %p15_p13 = scmp.ge.s32.totalorder %s18_s20, 4   ;;  %s1520_s16 = smov %s977_s17 }
 0x1a2   : > { %s1521_s17 = smov %s1073_s28  ;;  %s1522_s18 = smov %s985_s19 }
 0x1a3   : > { %s1523_s19 = smov %s1525_s23  ;;  %17 = sbr.rel (!%p15_p13) target bundleno = 5 (0x5), region = 84 }
 0x1a8   :  { %736 = vsyncpa [#allocation4], 1 }
 0x1a9   :  { %738 = vsyncpa [#allocation4 + $0x1], 1 }
 0x1aa   :  { %739 = vsyncpa [#allocation5], 1 }
 0x1ab   :  { %741 = vsyncpa [#allocation5 + $0x1], 1 }

</bundles_post_ra>
